<compile_context>
chip_gen: v7x
topology: tpu7x:2x2x1
jax: 0.10.0
libtpu: 0.0.40
codegen_flags: <defaults>
</compile_context>

<pallas_src>
import functools

import jax
import jax.numpy as jnp
import numpy as np
from jax.experimental import pallas as pl
from jax.experimental.pallas import tpu as pltpu

TRUE_MH = 125000.0
MAX_DIFF = 125000.0
FACTOR_AT_MAX_DIFF = 0.05
STRETCH = float(np.sqrt(np.log(1.0 / FACTOR_AT_MAX_DIFF)))
EPS_ENTROPY = 1e-8

_LANE = 128
_STATS_MAX_TILE = 8192   # lanes per stats grid step (large tile amortizes grid overhead)


# ----------------------------------------------------------------------------
# Helpers
# ----------------------------------------------------------------------------
def _round_up(x, m):
    return (x + m - 1) // m * m


def _vmem_capacity_bytes():
    """Physical VMEM per TensorCore; conservative 64 MiB fallback (v7x-safe)."""
    try:
        cap = int(getattr(pltpu.get_tpu_info(), "vmem_capacity_bytes", 0))
        if cap > 0:
            return cap
    except Exception:
        pass
    return 64 << 20


def _pick_batch_tile(batch, seq, itemsize, budget_bytes):
    """Largest divisor of `batch` whose double-buffered attn block fits budget."""
    per_sample = 2 * seq * seq * itemsize        # double-buffered bytes / sample
    max_bt = max(1, budget_bytes // per_sample)
    if max_bt >= batch:
        return batch
    for bt in range(int(max_bt), 0, -1):         # no %8 requirement: bbt is not a
        if batch % bt == 0:                      # minor-2 block dim
            return bt
    return 1


# ----------------------------------------------------------------------------
# Kernel 1: weighted CE + masked weighted-correlation statistics (lane-dense)
#   Single fused operand f (R, Bt):
#     rows [0, C)        logits.T
#     rows [C, 2C)       target probabilities .T
#     row  2C            weights
#     row  2C+1          centered x  ( (1 - logit0) - mean, correlation is shift-inv. )
#     row  2C+2          centered masses_qq
#     row  2C+3          centered masses_lv
#     row  2C+4          mHs (only when weight_by_mH)
# ----------------------------------------------------------------------------
def _stats_kernel(C, weight_by_mh, f_ref, stats_ref):
    i = pl.program_id(0)

    f = f_ref[...]                                   # (R, Bt) f32
    x = f[0:C, :]
    t = f[C:2 * C, :]
    base = 2 * C
    w = f[base:base + 1, :]
    xs = f[base + 1:base + 2, :]
    mqq = f[base + 2:base + 3, :]
    mlv = f[base + 3:base + 4, :]
    if weight_by_mh:
        mh = f[base + 4:base + 5, :]
        d = (mh - TRUE_MH) * (STRETCH / MAX_DIFF)
        w = w * jnp.exp(-(d * d))                    # mul+exp instead of div by exp

    # Soft-target cross entropy: -sum_c t[c, :] * log_softmax(x)[c, :]
    m = jnp.max(x, axis=0, keepdims=True)
    z = x - m
    lse = jnp.log(jnp.sum(jnp.exp(z), axis=0, keepdims=True))
    logp = z - lse
    ce_w = -jnp.sum(t * logp, axis=0, keepdims=True) * w          # (1, Bt)

    # background mask: argmax(targets) == 0  (class 0 attains the row max)
    bkg = (t[0:1, :] >= jnp.max(t, axis=0, keepdims=True)).astype(jnp.float32)
    wb = w * bkg
    ys = jnp.where(x[1:2, :] > x[2:3, :], mlv, mqq)

    # stats rows = [sum(ce*w), sum(w), sum(wb), sum(wb*x), sum(wb*y),
    #               sum(wb*x^2), sum(wb*y^2), sum(wb*x*y)]
    stack = jnp.concatenate(
        [ce_w, w, wb, wb * xs, wb * ys, wb * xs * xs, wb * ys * ys,
         wb * xs * ys], axis=0)                                    # (8, Bt)
    partial = jnp.sum(stack, axis=1, keepdims=True)                # (8, 1)

    @pl.when(i == 0)
    def _():
        stats_ref[...] = jnp.zeros_like(stats_ref)

    stats_ref[...] += partial


# ----------------------------------------------------------------------------
# Kernel 2: attention entropy, per-(layer, head) partials, batch-tiled.
#   ent_w already contains mask * 1/(den * B): the per-sample mean and the
#   batch mean are fused, so the kernel is a pure weighted reduction.
# ----------------------------------------------------------------------------
def _entropy_kernel(attn_ref, w_ref, out_ref):
    bt = pl.program_id(2)

    @pl.when(bt == 0)
    def _():
        out_ref[...] = jnp.zeros_like(out_ref)

    a = attn_ref[...].astype(jnp.float32)                          # (Bt, S, S)
    ent = -jnp.sum(a * jnp.log(a + EPS_ENTROPY), axis=-1)          # (Bt, S)
    out_ref[...] += jnp.sum(ent * w_ref[...])


# ----------------------------------------------------------------------------
# Wrapper
# ----------------------------------------------------------------------------
def hep_loss_pallas(inputs, targets, weights, masses_qq, masses_lv, mHs,
                    attn_weights, type_input, *,
                    padding_token=0,
                    weight_by_mH=False,
                    alpha=1.0,
                    apply_correlation_penalty=True,
                    calc_entropy_loss=True,
                    use_entropy_loss=True,
                    entropy_weight=1e-3):
    B, C = inputs.shape

    # ---- stats kernel: one fused lane-dense operand, batch on the lane axis -
    bt = min(_STATS_MAX_TILE, _round_up(B, _LANE))
    b_pad = _round_up(B, bt)
    n_tiles = b_pad // bt
    pad = b_pad - B

    x_f32 = inputs.astype(jnp.float32)
    t_f32 = targets.astype(jnp.float32)

    # Center both correlation variables by constants (correlation is shift
    # invariant) so raw-moment accumulation does not cancel catastrophically.
    x0 = 1.0 - x_f32[:, 0]
    x_shift = jnp.mean(x0)
    y_shift = 0.5 * (jnp.mean(masses_qq.astype(jnp.float32)) +
                     jnp.mean(masses_lv.astype(jnp.float32)))

    rows = [weights.astype(jnp.float32),
            x0 - x_shift,
            masses_qq.astype(jnp.float32) - y_shift,
            masses_lv.astype(jnp.float32) - y_shift]
    if weight_by_mH:          # only DMA mH when the kernel actually reads it
        rows.append(mHs.astype(jnp.float32))

    fused = jnp.concatenate([x_f32.T, t_f32.T, jnp.stack(rows, axis=0)], axis=0)
    # zero padding is exact: padded samples have w = 0 so every statistic is 0
    fused = jnp.pad(fused, ((0, 0), (0, pad)))
    R = fused.shape[0]

    stats = pl.pallas_call(
        functools.partial(_stats_kernel, C, weight_by_mH),
        out_shape=jax.ShapeDtypeStruct((8, 1), jnp.float32),
        grid=(n_tiles,),
        in_specs=[pl.BlockSpec((R, bt), lambda i: (0, i))],
        out_specs=pl.BlockSpec((8, 1), lambda i: (0, 0)),
        compiler_params=pltpu.CompilerParams(
            dimension_semantics=("arbitrary",)),
    )(fused)

    s = stats[:, 0]
    ce_sum, w_sum, sw, sx, sy, sxx, syy, sxy = (s[i] for i in range(8))

    ce_total = ce_sum / w_sum

    # weighted Pearson correlation over background events, from centered moments
    cov = sxy - sx * sy / sw
    varx = sxx - sx * sx / sw
    vary = syy - sy * sy / sw
    correlation_loss = (cov / jnp.sqrt(varx * vary)) ** 2

    total_loss = ce_total
    if apply_correlation_penalty:
        total_loss = total_loss + alpha * correlation_loss

    total_entropy_loss = jnp.float32(0.0)
    if calc_entropy_loss:
        L, H, Bb, S, _ = attn_weights.shape

        # (layer, head)-invariant weight hoisted out of the kernel; the 1/B of
        # the batch mean is folded in as well.
        mask = (type_input != padding_token).astype(jnp.float32)        # (B, S)
        inv_den = 1.0 / (jnp.sum(mask, axis=-1, keepdims=True) * Bb)    # (B, 1)
        ent_w = mask * inv_den                                          # (B, S)
        # TODO(synk): a fully padded sample makes ent_w infinite, matching the
        # reference semantics (which also divides by zero in that case).

        # Generation-aware VMEM sizing (v7x has only 64 MiB per TensorCore).
        vmem_cap = _vmem_capacity_bytes()
        attn_budget = max(8 << 20, vmem_cap // 8)      # double-buffered attn block
        vmem_limit = max(32 << 20, int(0.75 * vmem_cap))

        bbt = _pick_batch_tile(Bb, S, attn_weights.dtype.itemsize, attn_budget)
        n_bt = Bb // bbt

        # TODO(synk): on v7x, CORE_PARALLEL on the leading (L) axis (or a
        # core_map split of L*H) would shard this kernel across both
        # TensorCores; kept generation-agnostic "parallel" semantics here.
        # For S far below 128, flattening the cache to (L, H, B, S*S) would
        # give lane-dense EUP/VALU work; kept the native (bbt, S, S) block.
        ent = pl.pallas_call(
            _entropy_kernel,
            out_shape=jax.ShapeDtypeStruct((L, H, 1, _LANE), jnp.float32),
            grid=(L, H, n_bt),
            in_specs=[
                pl.BlockSpec((None, None, bbt, S, S),
                             lambda l, h, b: (l, h, b, 0, 0)),
                pl.BlockSpec((bbt, S), lambda l, h, b: (b, 0)),
            ],
            out_specs=pl.BlockSpec((None, None, 1, _LANE),
                                   lambda l, h, b: (l, h, 0, 0)),
            compiler_params=pltpu.CompilerParams(
                dimension_semantics=("parallel", "parallel", "arbitrary"),
                vmem_limit_bytes=vmem_limit),
        )(attn_weights, ent_w)   # attention read in its native dtype (no upcast)

        total_entropy_loss = jnp.sum(ent[:, :, 0, 0])
        total_heads = L * H
        if use_entropy_loss:
            total_loss = total_loss + entropy_weight * (
                total_entropy_loss / total_heads)

    return total_loss, ce_total, correlation_loss, total_entropy_loss


# ----------------------------------------------------------------------------
# Pure-JAX reference (mirrors the PyTorch forward) for verification
# ----------------------------------------------------------------------------
def hep_loss_ref(inputs, targets, weights, masses_qq, masses_lv, mHs,
                 attn_weights, type_input, *,
                 padding_token=0, weight_by_mH=False, alpha=1.0,
                 apply_correlation_penalty=True, calc_entropy_loss=True,
                 use_entropy_loss=True, entropy_weight=1e-3):
    w = weights.astype(jnp.float32)
    if weight_by_mH:
        w = w / jnp.exp(((mHs - TRUE_MH) / MAX_DIFF * STRETCH) ** 2)
    logp = jax.nn.log_softmax(inputs.astype(jnp.float32), axis=-1)
    ce = -jnp.sum(targets * logp, axis=-1)
    ce_w = ce * w

    bkg = (jnp.argmax(targets, axis=-1) == 0).astype(jnp.float32)
    x = 1.0 - inputs[:, 0]
    y = jnp.where(inputs[:, 1] > inputs[:, 2], masses_lv, masses_qq)
    wb = w * bkg
    sw = jnp.sum(wb)
    mx = jnp.sum(wb * x) / sw
    my = jnp.sum(wb * y) / sw
    cov = jnp.sum(wb * (x - mx) * (y - my))
    corr = cov / jnp.sqrt(jnp.sum(wb * (x - mx) ** 2) *
                          jnp.sum(wb * (y - my) ** 2))
    correlation_loss = corr ** 2

    total_loss = jnp.sum(ce_w) / jnp.sum(w)
    if apply_correlation_penalty:
        total_loss = total_loss + alpha * correlation_loss

    total_entropy_loss = jnp.float32(0.0)
    total_heads = 0
    if calc_entropy_loss:
        L, H = attn_weights.shape[:2]
        mask = (type_input != padding_token).astype(jnp.float32)
        for l in range(L):
            for h in range(H):
                a = attn_weights[l, h].astype(jnp.float32)
                ent = -jnp.sum(a * jnp.log(a + EPS_ENTROPY), axis=-1)
                per_batch = jnp.sum(ent * mask, axis=-1) / jnp.sum(mask, axis=-1)
                total_entropy_loss = total_entropy_loss + jnp.mean(per_batch)
                total_heads += 1
        if use_entropy_loss:
            total_loss = total_loss + entropy_weight * (
                total_entropy_loss / total_heads)
    return total_loss, correlation_loss, total_entropy_loss


if __name__ == "__main__":
    key = jax.random.PRNGKey(0)
    B, C = 8, 3          # batch, classes
    L, H, S = 2, 2, 8    # layers, heads, sequence length
    padding_token = 0

    k1, k2, k3, k4, k5, k6, k7 = jax.random.split(key, 7)

    inputs = jax.random.normal(k1, (B, C), dtype=jnp.float32)
    classes = jnp.array([0, 1, 2, 0, 1, 2, 0, 0], dtype=jnp.int32)
    targets = jax.nn.one_hot(classes, C, dtype=jnp.float32)
    weights = jax.random.uniform(k2, (B,), minval=0.5, maxval=1.5,
                                 dtype=jnp.float32)
    masses_qq = jax.random.uniform(k3, (B,), minval=50.0, maxval=200.0,
                                   dtype=jnp.float32)
    masses_lv = jax.random.uniform(k4, (B,), minval=50.0, maxval=200.0,
                                   dtype=jnp.float32)
    mHs = jax.random.uniform(k5, (B,), minval=80000.0, maxval=170000.0,
                             dtype=jnp.float32)

    # synthetic activation cache: attention weights per layer/head (stored in
    # the narrow native dtype, bf16) and type ids
    attn_logits = jax.random.normal(k6, (L, H, B, S, S), dtype=jnp.float32)
    attn_weights = jax.nn.softmax(attn_logits, axis=-1).astype(jnp.bfloat16)
    lengths = jnp.array([8, 7, 6, 5, 8, 7, 6, 5], dtype=jnp.int32)
    valid = (jnp.arange(S)[None, :] < lengths[:, None])
    type_vals = jax.random.randint(k7, (B, S), 1, 4, dtype=jnp.int32)
    type_input = jnp.where(valid, type_vals, padding_token)

    total, ce_total, corr_loss, ent_loss = hep_loss_pallas(
        inputs, targets, weights, masses_qq, masses_lv, mHs,
        attn_weights, type_input,
        padding_token=padding_token,
        weight_by_mH=False,
        alpha=1.0,
        apply_correlation_penalty=True,
        calc_entropy_loss=True,
        use_entropy_loss=True,
        entropy_weight=1e-3,
    )
    jax.block_until_ready(total)

    ref_total, ref_corr, ref_ent = hep_loss_ref(
        inputs, targets, weights, masses_qq, masses_lv, mHs,
        attn_weights, type_input,
        padding_token=padding_token,
        weight_by_mH=False,
        alpha=1.0,
        apply_correlation_penalty=True,
        calc_entropy_loss=True,
        use_entropy_loss=True,
        entropy_weight=1e-3,
    )

    np.testing.assert_allclose(np.asarray(total), np.asarray(ref_total),
                               rtol=2e-3, atol=1e-4)
    np.testing.assert_allclose(np.asarray(corr_loss), np.asarray(ref_corr),
                               rtol=2e-3, atol=1e-4)
    np.testing.assert_allclose(np.asarray(ent_loss), np.asarray(ref_ent),
                               rtol=2e-3, atol=1e-4)

    # TODO(synk): wandb logging and the dict-of-dicts activation cache API have
    # no Pallas equivalent; the cache is modeled as a dense (L,H,B,S,S) tensor.
    print("KERNEL_OK")
</pallas_src>

<mosaic_0001>
module attributes {stable_mosaic.version = 11 : i64} {
  func.func @_stats_kernel(%arg0: i32, %arg1: memref<10x128xf32, #tpu.memory_space<vmem>>, %arg2: memref<8x1xf32, #tpu.memory_space<vmem>>) attributes {dimension_semantics = [#tpu.dimension_semantics<arbitrary>], iteration_bounds = array<i64: 1>, scalar_prefetch = 0 : i64, scratch_operands = 0 : i64, tpu.core_type = #tpu.core_type<tc>, window_params = [{transform_indices = @transform_0, window_bounds = array<i64: 10, 128>}, {pipeline_mode = #tpu.pipeline_mode<synchronous>, transform_indices = @transform_1, window_bounds = array<i64: 8, 1>}]} {
    %c0 = arith.constant 0 : index
    %c0_0 = arith.constant 0 : index
    %0 = vector.load %arg1[%c0, %c0_0] : memref<10x128xf32, #tpu.memory_space<vmem>>, vector<10x128xf32>
    %1 = vector.extract_strided_slice %0 {offsets = [0, 0], sizes = [3, 128], strides = [1, 1]} : vector<10x128xf32> to vector<3x128xf32>
    %2 = vector.extract_strided_slice %0 {offsets = [3, 0], sizes = [3, 128], strides = [1, 1]} : vector<10x128xf32> to vector<3x128xf32>
    %3 = vector.extract_strided_slice %0 {offsets = [6, 0], sizes = [1, 128], strides = [1, 1]} : vector<10x128xf32> to vector<1x128xf32>
    %4 = vector.extract_strided_slice %0 {offsets = [7, 0], sizes = [1, 128], strides = [1, 1]} : vector<10x128xf32> to vector<1x128xf32>
    %5 = vector.extract_strided_slice %0 {offsets = [8, 0], sizes = [1, 128], strides = [1, 1]} : vector<10x128xf32> to vector<1x128xf32>
    %6 = vector.extract_strided_slice %0 {offsets = [9, 0], sizes = [1, 128], strides = [1, 1]} : vector<10x128xf32> to vector<1x128xf32>
    %cst = arith.constant dense<0xFF800000> : vector<128xf32>
    %7 = vector.multi_reduction <maximumf>, %1, %cst [0] : vector<3x128xf32> to vector<128xf32>
    %8 = vector.shape_cast %7 : vector<128xf32> to vector<1x128xf32>
    %9 = vector.broadcast %8 : vector<1x128xf32> to vector<3x128xf32>
    %10 = arith.subf %1, %9 : vector<3x128xf32>
    %11 = math.exp %10 : vector<3x128xf32>
    %cst_1 = arith.constant dense<0.000000e+00> : vector<128xf32>
    %12 = vector.multi_reduction <add>, %11, %cst_1 [0] : vector<3x128xf32> to vector<128xf32>
    %13 = vector.shape_cast %12 : vector<128xf32> to vector<1x128xf32>
    %14 = math.log %13 : vector<1x128xf32>
    %15 = vector.broadcast %14 : vector<1x128xf32> to vector<3x128xf32>
    %16 = arith.subf %10, %15 : vector<3x128xf32>
    %17 = arith.mulf %2, %16 : vector<3x128xf32>
    %cst_2 = arith.constant dense<0.000000e+00> : vector<128xf32>
    %18 = vector.multi_reduction <add>, %17, %cst_2 [0] : vector<3x128xf32> to vector<128xf32>
    %19 = vector.shape_cast %18 : vector<128xf32> to vector<1x128xf32>
    %cst_3 = arith.constant 0.000000e+00 : f32
    %20 = vector.broadcast %cst_3 : f32 to vector<1x128xf32>
    %21 = arith.subf %20, %19 : vector<1x128xf32>
    %22 = arith.mulf %21, %3 : vector<1x128xf32>
    %23 = vector.extract_strided_slice %2 {offsets = [0, 0], sizes = [1, 128], strides = [1, 1]} : vector<3x128xf32> to vector<1x128xf32>
    %cst_4 = arith.constant dense<0xFF800000> : vector<128xf32>
    %24 = vector.multi_reduction <maximumf>, %2, %cst_4 [0] : vector<3x128xf32> to vector<128xf32>
    %25 = vector.shape_cast %24 : vector<128xf32> to vector<1x128xf32>
    %26 = arith.cmpf oge, %23, %25 : vector<1x128xf32>
    %27 = arith.extui %26 : vector<1x128xi1> to vector<1x128xi32>
    %28 = arith.sitofp %27 : vector<1x128xi32> to vector<1x128xf32>
    %29 = arith.mulf %3, %28 : vector<1x128xf32>
    %30 = vector.extract_strided_slice %1 {offsets = [1, 0], sizes = [1, 128], strides = [1, 1]} : vector<3x128xf32> to vector<1x128xf32>
    %31 = vector.extract_strided_slice %1 {offsets = [2, 0], sizes = [1, 128], strides = [1, 1]} : vector<3x128xf32> to vector<1x128xf32>
    %32 = arith.cmpf ogt, %30, %31 : vector<1x128xf32>
    %33 = arith.select %32, %6, %5 : vector<1x128xi1>, vector<1x128xf32>
    %34 = arith.mulf %29, %4 : vector<1x128xf32>
    %35 = arith.mulf %29, %33 : vector<1x128xf32>
    %36 = arith.mulf %29, %4 : vector<1x128xf32>
    %37 = arith.mulf %36, %4 : vector<1x128xf32>
    %38 = arith.mulf %29, %33 : vector<1x128xf32>
    %39 = arith.mulf %38, %33 : vector<1x128xf32>
    %40 = arith.mulf %29, %4 : vector<1x128xf32>
    %41 = arith.mulf %40, %33 : vector<1x128xf32>
    %42 = tpu.concatenate %22, %3, %29, %34, %35, %37, %39, %41 in 0 : vector<1x128xf32>, vector<1x128xf32>, vector<1x128xf32>, vector<1x128xf32>, vector<1x128xf32>, vector<1x128xf32>, vector<1x128xf32>, vector<1x128xf32> -> vector<8x128xf32>
    %cst_5 = arith.constant dense<0.000000e+00> : vector<8xf32>
    %43 = vector.multi_reduction <add>, %42, %cst_5 [1] : vector<8x128xf32> to vector<8xf32>
    %44 = vector.shape_cast %43 : vector<8xf32> to vector<8x1xf32>
    %c0_i32 = arith.constant 0 : i32
    %45 = arith.cmpi eq, %arg0, %c0_i32 : i32
    %46 = arith.extui %45 : i1 to i32
    %c0_i32_6 = arith.constant 0 : i32
    %47 = arith.cmpi ne, %46, %c0_i32_6 : i32
    scf.if %47 {
      %cst_11 = arith.constant 0.000000e+00 : f32
      %51 = vector.broadcast %cst_11 : f32 to vector<8x1xf32>
      %c0_12 = arith.constant 0 : index
      %c0_13 = arith.constant 0 : index
      %52 = vector.load %arg2[%c0_12, %c0_13] : memref<8x1xf32, #tpu.memory_space<vmem>>, vector<8x1xf32>
      tpu.vector_store %arg2[%c0_12, %c0_13], %51 {strides = array<i32>} : memref<8x1xf32, #tpu.memory_space<vmem>>, vector<8x1xf32>,
    } else {
    }
    %c0_7 = arith.constant 0 : index
    %c0_8 = arith.constant 0 : index
    %48 = vector.load %arg2[%c0_7, %c0_8] : memref<8x1xf32, #tpu.memory_space<vmem>>, vector<8x1xf32>
    %49 = arith.addf %48, %44 : vector<8x1xf32>
    %c0_9 = arith.constant 0 : index
    %c0_10 = arith.constant 0 : index
    %50 = vector.load %arg2[%c0_9, %c0_10] : memref<8x1xf32, #tpu.memory_space<vmem>>, vector<8x1xf32>
    tpu.vector_store %arg2[%c0_9, %c0_10], %49 {strides = array<i32>} : memref<8x1xf32, #tpu.memory_space<vmem>>, vector<8x1xf32>,
    return
  }
  func.func @transform_0(%arg0: i32) -> (i32, i32) {
    %c0_i32 = arith.constant 0 : i32
    %c0_i32_0 = arith.constant 0 : i32
    return %c0_i32, %arg0 : i32, i32
  }
  func.func @transform_1(%arg0: i32) -> (i32, i32) {
    %c0_i32 = arith.constant 0 : i32
    %c0_i32_0 = arith.constant 0 : i32
    %c0_i32_1 = arith.constant 0 : i32
    return %c0_i32, %c0_i32_0 : i32, i32
  }
}

</mosaic_0001>

<bundles_post_ra>
// kernel: tpu_custom_call.1
= control target key start
LH: loop header
LB: loop body
LE: loop exit
PB: predicated region body
PF: predicated region fallthrough
CT: control target
= control target key end

     0   :  { %6 = vsyncpa [#allocation3], 0  ;;  %s175_s6 = smov [#allocation2]   ;;  %s228_s0 = inlined_call_operand.hbm [shape: f32[10,128], index: 0, kind: input, shape index: {}]   ;;  %s229_s1 = inlined_call_operand.vmem [shape: f32[8,1], index: 1, kind: output, shape index: {}]  }
   0x1   :  { %s12_s7 = sshll.u32 %s175_s6, 4  ;;  %s151_s10 = scalar_lea.hbm %s228_s0, 256  ;;  %s13_s7 = int_to_ptr.vmem [resolvable:$true] %s12_s7 }
   0x2   :  { %p152_p0 = scmp.ne.s32.totalorder %s228_s0, %s151_s10  ;;  %p155_p1 = scmp.lt.u32.totalorder %s151_s10, %s228_s0 }
   0x4   :  { %p157_p2 = pnand %p155_p1, %p152_p0 }
   0x6   :  { %160 = shalt.err (!%p157_p2)
}
   0x7   :  { %s161_s15 = scalar_lea.vmem %s13_s7, 256  ;;  %p166_p4 = scmp.lt.s32.totalorder %s13_s7, %s13_s7 }
   0x8   :  { %p162_p3 = scmp.ne.s32.totalorder %s13_s7, %s161_s15  ;;  %p167_p5 = scmp.lt.s32.totalorder %s161_s15, %s161_s15 }
   0xa   :  { %p168_p6 = por %p167_p5, %p166_p4 }
   0xc   :  { %p169_p7 = pnand %p168_p6, %p162_p3 }
   0xe   :  { %172 = shalt.err (!%p169_p7)
}
   0xf   :  { %s176_s16 = smov 128   ;;  %s177_s17 = smov 8  }
  0x10   :  { %18 = dma.hbm_to_vmem [thread:$0]  %s228_s0, 256, %s13_s7, [#allocation3], %s176_s16, %s176_s16, %s177_s17  }
  0x11   :  { %173 = dma.done.wait [#allocation3], 256  }
  0x12   :  { %174 = vsyncadd [#allocation3], 4294967040  ;;  %vm131_vm0 = vcmask 7168   ;;  %v178_v0 = vmov 0.0   ;;  %vm24_vm1 = vcmask 1042432   ;;  %v205_v1 = vld [vmem:[#allocation2] sm:$0xff] }
  0x13   :  { %132 = vst.msk [vmem:[%s229_s1] sm:$0xff] %vm131_vm0, %v178_v0  ;;  %v25_v2 = vsel %vm24_vm1, %v205_v1, -inf  ;;  %vm61_vm2 = vcmask 1045507   ;;  %v23_v33 = vld [vmem:[#allocation2 + $0x8] sm:$0x3]  ;;  %v77_v35 = vrot.slane %v205_v1, 1 }
  0x14   :  { %v26_v3 = vrot.slane %v25_v2, 4  ;;  %v62_v15 = vsel %vm61_vm2, %v205_v1, -inf  ;;  %v81_v39 = vrot.slane %v23_v33, 7  ;;  %v95_v52 = vrot.slane %v205_v1, 5 }
  0x15   :  { %v63_v17 = vrot.slane %v62_v15, 4  ;;  %vm79_vm4 = vcmp.gt.f32.partialorder %v205_v1, %v77_v35  ;;  %vm112_vm5 = vcmask 1040384   ;;  %vm114_vm6 = vcmask 1041408  }
  0x16   :  { %v27_v4 = vmax.f32 %v25_v2, %v26_v3  ;;  %v83_v43 = vsel %vm79_vm4, %v23_v33, %v81_v39  ;;  %vm117_vm7 = vcmask 1043456   ;;  %vm119_vm8 = vcmask 1044480  }
  0x17   :  { %v64_v20 = vmax.f32 %v62_v15, %v63_v17  ;;  %v86_v45 = vrot.slane %v83_v43, 3  ;;  %vm121_vm9 = vcmask 1045504   ;;  %vm123_vm10 = vcmask 1046528  }
  0x18   :  { %v28_v5 = vrot.slane %v27_v4, 2 }
  0x19   :  { %v65_v22 = vrot.slane %v64_v20, 2 }
  0x1a   :  { %v29_v6 = vmax.f32 %v27_v4, %v28_v5  ;;  %v133_v4 = vld [vmem:[%s229_s1] sm:$0xff] }
  0x1b   :  { %v66_v23 = vmax.f32 %v64_v20, %v65_v22 }
  0x1c   :  { %v30_v7 = vrot.slane %v29_v6, 1 }
  0x1d   :  { %v67_v25 = vrot.slane %v66_v23, 1 }
  0x1e   :  { %v31_v8 = vmax.f32 %v29_v6, %v30_v7 }
  0x1f   :  { %v68_v28 = vmax.f32 %v66_v23, %v67_v25 }
  0x20   :  { %v32_v9 = vsub.f32 %v205_v1, %v31_v8 }
  0x21   :  { %vm69_vm3 = vcmp.ge.f32.partialorder %v205_v1, %v68_v28 }
  0x22   :  { %v33_v10 = vmul.f32 1.442695, %v32_v9  ;;  %v142_v32 = vsel %vm69_vm3, 1.0, %v178_v0 }
  0x23   :  { %v73_v37 = vrot.slane %v142_v32, 5 }
  0x24   :  { %147 = vpow2.f32 %v33_v10 }
  0x25   :  { %v75_v41 = vmul.f32 %v73_v37, %v205_v1 }
  0x27   :  { %v84_v47 = vmul.f32 %v77_v35, %v75_v41  ;;  %v88_v49 = vmul.f32 %v86_v45, %v75_v41  ;;  %v98_v53 = vrot.slane %v75_v41, 4 }
  0x29   :  { %v89_v51 = vmul.f32 %v84_v47, %v77_v35  ;;  %v91_v54 = vmul.f32 %v86_v45, %v84_v47  ;;  %v101_v56 = vrot.slane %v84_v47, 3  ;;  %v104_v57 = vrot.slane %v88_v49, 2 }
  0x2a   :  { %v90_v60 = vmul.f32 %v88_v49, %v86_v45 }
  0x2b   :  { %v107_v58 = vrot.slane %v89_v51, 1  ;;  %v110_v62 = vrot.slane %v91_v54, 7 }
  0x2e   :  { %v148_v11 = vpop.eup %147 }
  0x2f   :  { %v35_v12 = vsel %vm24_vm1, %v148_v11, 0.0 }
  0x30   :  { %v36_v13 = vrot.slane %v35_v12, 4 }
  0x32   :  { %v37_v14 = vadd.f32 %v36_v13, %v35_v12 }
  0x34   :  { %v38_v16 = vrot.slane %v37_v14, 2 }
  0x36   :  { %v39_v18 = vadd.f32 %v38_v16, %v37_v14 }
  0x38   :  { %v40_v19 = vrot.slane %v39_v18, 1 }
  0x3a   :  { %v41_v21 = vadd.f32 %v40_v19, %v39_v18 }
  0x3c   :  { %149 = vlog2.f32 %v41_v21 }
  0x46   :  { %v150_v24 = vpop.eup %149 }
  0x47   :  { %v43_v26 = vmul.f32 0.6931472, %v150_v24 }
  0x49   :  { %v44_v27 = vsub.f32 %v32_v9, %v43_v26 }
  0x4b   :  { %v46_v29 = vrot.slane %v44_v27, 5 }
  0x4d   :  { %v48_v30 = vmul.f32 %v46_v29, %v205_v1 }
  0x4f   :  { %v50_v31 = vrot.slane %v48_v30, 3 }
  0x51   :  { %v52_v34 = vsel %vm24_vm1, %v50_v31, 0.0 }
  0x52   :  { %v53_v36 = vrot.slane %v52_v34, 4 }
  0x54   :  { %v54_v38 = vadd.f32 %v53_v36, %v52_v34 }
  0x56   :  { %v55_v40 = vrot.slane %v54_v38, 2 }
  0x58   :  { %v56_v42 = vadd.f32 %v55_v40, %v54_v38 }
  0x5a   :  { %v57_v44 = vrot.slane %v56_v42, 1 }
  0x5c   :  { %v58_v46 = vadd.f32 %v57_v44, %v56_v42 }
  0x5e   :  { %v59_v48 = vsub.f32 0.0, %v58_v46 }
  0x60   :  { %v60_v50 = vmul.f32 %v59_v48, %v205_v1 }
  0x62   :  { %v93_v55 = vrot.slane %v60_v50, 6 }
  0x64   :  { %v113_v59 = vsel %vm112_vm5, %v93_v55, %v95_v52 }
  0x65   :  { %v115_v61 = vsel %vm114_vm6, %v113_v59, %v98_v53 }
  0x66   :  { %v116_v63 = vsel %vm24_vm1, %v115_v61, %v101_v56 }
  0x67   :  { %v118_v0 = vsel %vm117_vm7, %v116_v63, %v104_v57 }
  0x68   :  { %v120_v1 = vsel %vm119_vm8, %v118_v0, %v107_v58 }
  0x69   :  { %v122_v2 = vsel %vm121_vm9, %v120_v1, %v90_v60 }
  0x6a   :  { %v124_v3 = vsel %vm123_vm10, %v122_v2, %v110_v62 }
  0x6b   :  { %125 = vadd.xlane.f32.xlu0 %v124_v3 }
  0xf8   :  { %v126_v5 = vpop.xlane.xlu0 %125 }
  0xf9   :  { %v134_v6 = vadd.f32 %v133_v4, %v126_v5 }
  0xfb   :  { %136 = vst.msk [vmem:[%s229_s1] sm:$0xff] %vm131_vm0, %v134_v6 }
  0xfc   :  { %141 = vsyncpa [#allocation3], 1 }

</bundles_post_ra>
